<compile_context>
chip_gen: v5e
topology: v5e:2x2
jax: 0.10.0
libtpu: 0.0.40
codegen_flags: <defaults>
</compile_context>

<pallas_src>
import functools

import jax
import jax.numpy as jnp
import numpy as np
from jax.experimental import pallas as pl
from jax.experimental.pallas import tpu as pltpu


def _round_up(x, m):
    return (x + m - 1) // m * m


def _cinchnet_kernel(a_hat_ref, a_hat_t_ref, x_ref, w_ref, b_ref, o_ref,
                     fcat_ref, *, K, F_blk):
    """One F_blk-lane feature slab: bf16 hop chain + fused lane-dense linear,
    accumulated into the resident output block."""
    i = pl.program_id(0)

    # Hop 0 = raw features for this slab (bf16), stored at lane offset 0.
    h = x_ref[...]                                    # (Np, F_blk) bf16
    fcat_ref[:, 0:F_blk] = h
    for t in range(K):                                # reversed graph: A_hat @ h
        h = jnp.dot(a_hat_ref[...], h,
                    preferred_element_type=jnp.float32).astype(jnp.bfloat16)
        fcat_ref[:, (t + 1) * F_blk:(t + 2) * F_blk] = h
    for t in range(K):                                # original graph: A_hat^T @ h
        h = jnp.dot(a_hat_t_ref[...], h,
                    preferred_element_type=jnp.float32).astype(jnp.bfloat16)
        fcat_ref[:, (K + t + 1) * F_blk:(K + t + 2) * F_blk] = h

    # Partial fused linear for this slab:
    #   (Np, (2K+1)*F_blk) bf16 @ ((2K+1)*F_blk, out_pad) bf16 -> f32.
    partial = jnp.dot(fcat_ref[...], w_ref[...],
                      preferred_element_type=jnp.float32)

    # Output block is resident across the ("arbitrary") feature-block axis:
    # initialize with the bias on step 0, accumulate afterwards.
    @pl.when(i == 0)
    def _():
        o_ref[...] = partial + b_ref[...]

    @pl.when(i != 0)
    def _():
        o_ref[...] += partial


def cinchnet_conv(A, X, W_t, b, maximum_dim, *, feature_block=128):
    """Pallas wrapper.

    A:   (N, N) dense adjacency with self loops (A[u, v] = 1 iff edge u -> v)
    X:   (N, F) f32 node features
    W_t: ((2*maximum_dim + 1) * F, out_feats) f32 (transposed nn.Linear weight)
    b:   (out_feats,) f32 bias
    feature_block: X lanes processed per grid step (128; use 256 on v6e/v7x).
    """
    N, F = X.shape
    lin_in, out_feats = W_t.shape
    K = int(maximum_dim)
    n_hops = 2 * K + 1
    assert lin_in == n_hops * F
    assert feature_block % 128 == 0

    F_blk = feature_block
    N_pad = _round_up(N, 8)
    F_pad = _round_up(F, F_blk)
    out_pad = _round_up(out_feats, 128)
    n_fblk = F_pad // F_blk

    # --- fold degree normalization into the adjacency ONCE (wrapper, f32) ----
    A_p = jnp.zeros((N_pad, N_pad), jnp.float32).at[:N, :N].set(A)
    deg = jnp.sum(A_p, axis=0)                        # in-degree of v = column sum
    norm = jax.lax.rsqrt(jnp.maximum(deg, 1.0))
    A_hat = (norm[:, None] * A_p) * norm[None, :]     # D^-1/2 A D^-1/2
    A_hat_bf = A_hat.astype(jnp.bfloat16)
    A_hat_t_bf = A_hat_bf.T                           # transposed once, outside the kernel

    # --- zero-pad / regroup operands to lane-dense bf16 layouts --------------
    X_p = (jnp.zeros((N_pad, F_pad), jnp.float32).at[:N, :F].set(X)
           .astype(jnp.bfloat16))

    # nn.Linear weight rows are hop-major / feature-minor; pad per hop, regroup
    # to [fblk-major, hop, lane] so grid step i reads one contiguous 2-D slab.
    W_p = jnp.zeros((n_hops, F_pad, out_pad), jnp.float32)
    W_p = W_p.at[:, :F, :out_feats].set(W_t.reshape(n_hops, F, out_feats))
    W_blocks = (W_p.reshape(n_hops, n_fblk, F_blk, out_pad)
                   .transpose(1, 0, 2, 3)
                   .reshape(n_fblk * n_hops * F_blk, out_pad)
                   .astype(jnp.bfloat16))
    b_p = jnp.zeros((1, out_pad), jnp.float32).at[0, :out_feats].set(b)

    kernel = functools.partial(_cinchnet_kernel, K=K, F_blk=F_blk)

    # --- VMEM budget: single-buffered residents + double-buffered slabs ------
    resident = (2 * N_pad * N_pad * 2                 # A_hat, A_hat^T (bf16, single)
                + out_pad * 4                         # bias
                + N_pad * out_pad * 4                 # resident output accumulator
                + N_pad * n_hops * F_blk * 2)         # fcat scratch (bf16)
    pipelined = 2 * (N_pad * F_blk * 2                # X slab (bf16, double buffered)
                     + n_hops * F_blk * out_pad * 2)  # W slab (bf16, double buffered)
    need = resident + pipelined
    try:
        vmem_cap = int(pltpu.get_tpu_info().vmem_capacity_bytes)
    except Exception:                                 # conservative fall-back (v7x: 64 MiB)
        vmem_cap = 64 << 20
    vmem_limit = int(min(max(2 * need, 16 << 20), vmem_cap - (16 << 20)))

    flops = (2 * (2 * K) * N_pad * N_pad * F_pad          # hop chain
             + 2 * N_pad * n_hops * F_pad * out_pad)      # fused linear
    bytes_accessed = (2 * N_pad * N_pad * 2 + X_p.size * 2 + W_blocks.size * 2
                      + out_pad * 4 + N_pad * out_pad * 4)

    out = pl.pallas_call(
        kernel,
        out_shape=jax.ShapeDtypeStruct((N_pad, out_pad), jnp.float32),
        grid=(n_fblk,),
        in_specs=[
            # Grid-invariant inputs: whole array resident in VMEM once
            # (no per-step DMA, no double-buffering).
            pl.BlockSpec(memory_space=pltpu.MemorySpace.VMEM),          # A_hat (bf16)
            pl.BlockSpec(memory_space=pltpu.MemorySpace.VMEM),          # A_hat^T (bf16)
            pl.BlockSpec((N_pad, F_blk), lambda i: (0, i)),             # X feature slab
            pl.BlockSpec((n_hops * F_blk, out_pad), lambda i: (i, 0)),  # W slab (bf16)
            pl.BlockSpec(memory_space=pltpu.MemorySpace.VMEM),          # bias
        ],
        # Constant index map => output stays resident and is accumulated
        # in-kernel; written back to HBM once after the last feature block.
        out_specs=pl.BlockSpec((N_pad, out_pad), lambda i: (0, 0)),
        scratch_shapes=[
            pltpu.VMEM((N_pad, n_hops * F_blk), jnp.bfloat16),          # hop concat
        ],
        compiler_params=pltpu.CompilerParams(
            dimension_semantics=("arbitrary",),
            vmem_limit_bytes=vmem_limit,
        ),
        cost_estimate=pl.CostEstimate(
            flops=int(flops),
            transcendentals=0,
            bytes_accessed=int(bytes_accessed),
        ),
    )(A_hat_bf, A_hat_t_bf, X_p, W_blocks, b_p)

    # Un-pad (seed-node gather of the reference module is out of scope).
    return out[:N, :out_feats]


def _reference(A, X, W_t, b, K):
    """Pure-JAX f32 reference using A_hat = D^-1/2 A D^-1/2 (mathematically
    identical to forward()'s per-hop norm multiplications)."""
    deg = jnp.sum(A, axis=0)                            # in-degrees, (N,)
    norm = jax.lax.rsqrt(jnp.maximum(deg, 1.0))
    A_hat = (norm[:, None] * A) * norm[None, :]
    mm = functools.partial(jnp.dot, precision=jax.lax.Precision.HIGHEST)
    fstack = [X]
    h = X
    for _ in range(K):                                  # reversed graph
        h = mm(A_hat, h)
        fstack.append(h)
    for _ in range(K):                                  # original graph
        h = mm(A_hat.T, h)
        fstack.append(h)
    cat = jnp.concatenate(fstack, axis=-1)
    return mm(cat, W_t) + b[None, :]


def _make_case(key, N, in_feats, out_feats, maximum_dim, p_edge=0.3):
    k_adj, k_feat, k_w, k_b = jax.random.split(key, 4)
    lin_in = in_feats * (2 * maximum_dim + 1)
    # Dense adjacency with self loops (dgl.add_self_loop equivalent).
    A = (jax.random.uniform(k_adj, (N, N)) < p_edge).astype(jnp.float32)
    A = jnp.maximum(A, jnp.eye(N, dtype=jnp.float32))
    X = jax.random.normal(k_feat, (N, in_feats), dtype=jnp.float32)
    # nn.Linear params: Xavier-normal weight (gain=relu), default uniform bias.
    gain = float(np.sqrt(2.0))                               # calculate_gain('relu')
    std = gain * float(np.sqrt(2.0 / (lin_in + out_feats)))  # xavier_normal_
    W = std * jax.random.normal(k_w, (out_feats, lin_in), dtype=jnp.float32)
    bound = 1.0 / float(np.sqrt(lin_in))
    b = jax.random.uniform(k_b, (out_feats,), minval=-bound, maxval=bound,
                           dtype=jnp.float32)
    return A, X, W.T, b


if __name__ == "__main__":
    key = jax.random.PRNGKey(0)
    k1, k2 = jax.random.split(key)

    # bf16 MXU inputs with f32 accumulation -> bf16-level tolerance vs f32 ref.
    rtol = atol = 5e-2

    # Case 1: single 128-lane feature block (n_fblk = 1), K = 2.
    A, X, W_t, b = _make_case(k1, N=16, in_feats=8, out_feats=16, maximum_dim=2)
    out = jax.block_until_ready(cinchnet_conv(A, X, W_t, b, 2))
    ref = _reference(A, X, W_t, b, 2)
    np.testing.assert_allclose(np.asarray(out), np.asarray(ref), rtol=rtol, atol=atol)

    # Case 2: two feature blocks (exercises the in-kernel output accumulation
    # path, program_id > 0), K = 1.
    A2, X2, W_t2, b2 = _make_case(k2, N=24, in_feats=192, out_feats=24, maximum_dim=1)
    out2 = jax.block_until_ready(cinchnet_conv(A2, X2, W_t2, b2, 1, feature_block=128))
    ref2 = _reference(A2, X2, W_t2, b2, 1)
    np.testing.assert_allclose(np.asarray(out2), np.asarray(ref2), rtol=rtol, atol=atol)

    # Case 3: same problem with a 256-lane feature slab (v6e/v7x MXU width).
    out3 = jax.block_until_ready(cinchnet_conv(A2, X2, W_t2, b2, 1, feature_block=256))
    np.testing.assert_allclose(np.asarray(out3), np.asarray(ref2), rtol=rtol, atol=atol)

    print("KERNEL_OK")
</pallas_src>

<mosaic_0001>
module attributes {stable_mosaic.version = 11 : i64} {
  func.func @_cinchnet_kernel(%arg0: i32, %arg1: memref<16x16xbf16, #tpu.memory_space<vmem>>, %arg2: memref<16x16xbf16, #tpu.memory_space<vmem>>, %arg3: memref<16x128xbf16, #tpu.memory_space<vmem>>, %arg4: memref<640x128xbf16, #tpu.memory_space<vmem>>, %arg5: memref<1x128xf32, #tpu.memory_space<vmem>>, %arg6: memref<16x128xf32, #tpu.memory_space<vmem>>, %arg7: memref<16x640xbf16, #tpu.memory_space<vmem>>) attributes {dimension_semantics = [#tpu.dimension_semantics<arbitrary>], iteration_bounds = array<i64: 1>, scalar_prefetch = 0 : i64, scratch_operands = 1 : i64, tpu.core_type = #tpu.core_type<tc>, window_params = [{pipeline_mode = #tpu.pipeline_mode<synchronous>, transform_indices = @transform_0, window_bounds = array<i64: 16, 16>}, {pipeline_mode = #tpu.pipeline_mode<synchronous>, transform_indices = @transform_1, window_bounds = array<i64: 16, 16>}, {transform_indices = @transform_2, window_bounds = array<i64: 16, 128>}, {transform_indices = @transform_3, window_bounds = array<i64: 640, 128>}, {pipeline_mode = #tpu.pipeline_mode<synchronous>, transform_indices = @transform_4, window_bounds = array<i64: 1, 128>}, {pipeline_mode = #tpu.pipeline_mode<synchronous>, transform_indices = @transform_5, window_bounds = array<i64: 16, 128>}]} {
    %c0 = arith.constant 0 : index
    %c0_0 = arith.constant 0 : index
    %0 = vector.load %arg3[%c0, %c0_0] : memref<16x128xbf16, #tpu.memory_space<vmem>>, vector<16x128xbf16>
    %c0_1 = arith.constant 0 : index
    %c0_2 = arith.constant 0 : index
    %1 = vector.load %arg7[%c0_1, %c0_2] : memref<16x640xbf16, #tpu.memory_space<vmem>>, vector<16x128xbf16>
    tpu.vector_store %arg7[%c0_1, %c0_2], %0 {strides = array<i32>} : memref<16x640xbf16, #tpu.memory_space<vmem>>, vector<16x128xbf16>,
    %c0_3 = arith.constant 0 : index
    %c0_4 = arith.constant 0 : index
    %2 = vector.load %arg1[%c0_3, %c0_4] : memref<16x16xbf16, #tpu.memory_space<vmem>>, vector<16x16xbf16>
    %cst = arith.constant dense<0.000000e+00> : vector<16x128xf32>
    %3 = tpu.matmul %2, %0, %cst {dimension_numbers = #tpu.dot_dimension_numbers<[1], [0], [0], [1], [0, 0, 1, 1], [], []>} : vector<16x16xbf16>, vector<16x128xbf16>, vector<16x128xf32> -> vector<16x128xf32>
    %4 = arith.truncf %3 : vector<16x128xf32> to vector<16x128xbf16>
    %c0_5 = arith.constant 0 : index
    %c128 = arith.constant 128 : index
    %5 = vector.load %arg7[%c0_5, %c128] : memref<16x640xbf16, #tpu.memory_space<vmem>>, vector<16x128xbf16>
    tpu.vector_store %arg7[%c0_5, %c128], %4 {strides = array<i32>} : memref<16x640xbf16, #tpu.memory_space<vmem>>, vector<16x128xbf16>,
    %c0_6 = arith.constant 0 : index
    %c0_7 = arith.constant 0 : index
    %6 = vector.load %arg1[%c0_6, %c0_7] : memref<16x16xbf16, #tpu.memory_space<vmem>>, vector<16x16xbf16>
    %cst_8 = arith.constant dense<0.000000e+00> : vector<16x128xf32>
    %7 = tpu.matmul %6, %4, %cst_8 {dimension_numbers = #tpu.dot_dimension_numbers<[1], [0], [0], [1], [0, 0, 1, 1], [], []>} : vector<16x16xbf16>, vector<16x128xbf16>, vector<16x128xf32> -> vector<16x128xf32>
    %8 = arith.truncf %7 : vector<16x128xf32> to vector<16x128xbf16>
    %c0_9 = arith.constant 0 : index
    %c256 = arith.constant 256 : index
    %9 = vector.load %arg7[%c0_9, %c256] : memref<16x640xbf16, #tpu.memory_space<vmem>>, vector<16x128xbf16>
    tpu.vector_store %arg7[%c0_9, %c256], %8 {strides = array<i32>} : memref<16x640xbf16, #tpu.memory_space<vmem>>, vector<16x128xbf16>,
    %c0_10 = arith.constant 0 : index
    %c0_11 = arith.constant 0 : index
    %10 = vector.load %arg2[%c0_10, %c0_11] : memref<16x16xbf16, #tpu.memory_space<vmem>>, vector<16x16xbf16>
    %cst_12 = arith.constant dense<0.000000e+00> : vector<16x128xf32>
    %11 = tpu.matmul %10, %8, %cst_12 {dimension_numbers = #tpu.dot_dimension_numbers<[1], [0], [0], [1], [0, 0, 1, 1], [], []>} : vector<16x16xbf16>, vector<16x128xbf16>, vector<16x128xf32> -> vector<16x128xf32>
    %12 = arith.truncf %11 : vector<16x128xf32> to vector<16x128xbf16>
    %c0_13 = arith.constant 0 : index
    %c384 = arith.constant 384 : index
    %13 = vector.load %arg7[%c0_13, %c384] : memref<16x640xbf16, #tpu.memory_space<vmem>>, vector<16x128xbf16>
    tpu.vector_store %arg7[%c0_13, %c384], %12 {strides = array<i32>} : memref<16x640xbf16, #tpu.memory_space<vmem>>, vector<16x128xbf16>,
    %c0_14 = arith.constant 0 : index
    %c0_15 = arith.constant 0 : index
    %14 = vector.load %arg2[%c0_14, %c0_15] : memref<16x16xbf16, #tpu.memory_space<vmem>>, vector<16x16xbf16>
    %cst_16 = arith.constant dense<0.000000e+00> : vector<16x128xf32>
    %15 = tpu.matmul %14, %12, %cst_16 {dimension_numbers = #tpu.dot_dimension_numbers<[1], [0], [0], [1], [0, 0, 1, 1], [], []>} : vector<16x16xbf16>, vector<16x128xbf16>, vector<16x128xf32> -> vector<16x128xf32>
    %16 = arith.truncf %15 : vector<16x128xf32> to vector<16x128xbf16>
    %c0_17 = arith.constant 0 : index
    %c512 = arith.constant 512 : index
    %17 = vector.load %arg7[%c0_17, %c512] : memref<16x640xbf16, #tpu.memory_space<vmem>>, vector<16x128xbf16>
    tpu.vector_store %arg7[%c0_17, %c512], %16 {strides = array<i32>} : memref<16x640xbf16, #tpu.memory_space<vmem>>, vector<16x128xbf16>,
    %c0_18 = arith.constant 0 : index
    %c0_19 = arith.constant 0 : index
    %18 = vector.load %arg7[%c0_18, %c0_19] : memref<16x640xbf16, #tpu.memory_space<vmem>>, vector<16x640xbf16>
    %c0_20 = arith.constant 0 : index
    %c0_21 = arith.constant 0 : index
    %19 = vector.load %arg4[%c0_20, %c0_21] : memref<640x128xbf16, #tpu.memory_space<vmem>>, vector<640x128xbf16>
    %cst_22 = arith.constant dense<0.000000e+00> : vector<16x128xf32>
    %20 = tpu.matmul %18, %19, %cst_22 {dimension_numbers = #tpu.dot_dimension_numbers<[1], [0], [0], [1], [0, 0, 1, 1], [], []>} : vector<16x640xbf16>, vector<640x128xbf16>, vector<16x128xf32> -> vector<16x128xf32>
    %c0_i32 = arith.constant 0 : i32
    %21 = arith.cmpi eq, %arg0, %c0_i32 : i32
    %22 = arith.extui %21 : i1 to i32
    %c0_i32_23 = arith.constant 0 : i32
    %23 = arith.cmpi ne, %22, %c0_i32_23 : i32
    scf.if %23 {
      %c0_26 = arith.constant 0 : index
      %c0_27 = arith.constant 0 : index
      %27 = vector.load %arg5[%c0_26, %c0_27] : memref<1x128xf32, #tpu.memory_space<vmem>>, vector<1x128xf32>
      %28 = vector.broadcast %27 : vector<1x128xf32> to vector<16x128xf32>
      %29 = arith.addf %20, %28 : vector<16x128xf32>
      %c0_28 = arith.constant 0 : index
      %c0_29 = arith.constant 0 : index
      %30 = vector.load %arg6[%c0_28, %c0_29] : memref<16x128xf32, #tpu.memory_space<vmem>>, vector<16x128xf32>
      tpu.vector_store %arg6[%c0_28, %c0_29], %29 {strides = array<i32>} : memref<16x128xf32, #tpu.memory_space<vmem>>, vector<16x128xf32>,
    } else {
    }
    %c0_i32_24 = arith.constant 0 : i32
    %24 = arith.cmpi ne, %arg0, %c0_i32_24 : i32
    %25 = arith.extui %24 : i1 to i32
    %c0_i32_25 = arith.constant 0 : i32
    %26 = arith.cmpi ne, %25, %c0_i32_25 : i32
    scf.if %26 {
      %c0_26 = arith.constant 0 : index
      %c0_27 = arith.constant 0 : index
      %27 = vector.load %arg6[%c0_26, %c0_27] : memref<16x128xf32, #tpu.memory_space<vmem>>, vector<16x128xf32>
      %28 = arith.addf %27, %20 : vector<16x128xf32>
      %c0_28 = arith.constant 0 : index
      %c0_29 = arith.constant 0 : index
      %29 = vector.load %arg6[%c0_28, %c0_29] : memref<16x128xf32, #tpu.memory_space<vmem>>, vector<16x128xf32>
      tpu.vector_store %arg6[%c0_28, %c0_29], %28 {strides = array<i32>} : memref<16x128xf32, #tpu.memory_space<vmem>>, vector<16x128xf32>,
    } else {
    }
    return
  }
  func.func @transform_0(%arg0: i32) -> (i32, i32) {
    %c0_i32 = arith.constant 0 : i32
    %c0_i32_0 = arith.constant 0 : i32
    %c0_i32_1 = arith.constant 0 : i32
    return %c0_i32, %c0_i32_0 : i32, i32
  }
  func.func @transform_1(%arg0: i32) -> (i32, i32) {
    %c0_i32 = arith.constant 0 : i32
    %c0_i32_0 = arith.constant 0 : i32
    %c0_i32_1 = arith.constant 0 : i32
    return %c0_i32, %c0_i32_0 : i32, i32
  }
  func.func @transform_2(%arg0: i32) -> (i32, i32) {
    %c0_i32 = arith.constant 0 : i32
    %c0_i32_0 = arith.constant 0 : i32
    return %c0_i32, %arg0 : i32, i32
  }
  func.func @transform_3(%arg0: i32) -> (i32, i32) {
    %c0_i32 = arith.constant 0 : i32
    %c0_i32_0 = arith.constant 0 : i32
    return %arg0, %c0_i32 : i32, i32
  }
  func.func @transform_4(%arg0: i32) -> (i32, i32) {
    %c0_i32 = arith.constant 0 : i32
    %c0_i32_0 = arith.constant 0 : i32
    %c0_i32_1 = arith.constant 0 : i32
    return %c0_i32, %c0_i32_0 : i32, i32
  }
  func.func @transform_5(%arg0: i32) -> (i32, i32) {
    %c0_i32 = arith.constant 0 : i32
    %c0_i32_0 = arith.constant 0 : i32
    %c0_i32_1 = arith.constant 0 : i32
    return %c0_i32, %c0_i32_0 : i32, i32
  }
}

</mosaic_0001>

<bundles_post_ra>
// kernel: tpu_custom_call.1
= control target key start
LH: loop header
LB: loop body
LE: loop exit
PB: predicated region body
PF: predicated region fallthrough
CT: control target
= control target key end

     0   :  { %10 = vsyncpa [#allocation4], 0  ;;  %s1144_s0 = inlined_call_operand.hbm [shape: bf16[16,16], index: 0, kind: input, shape index: {}]   ;;  %s1145_s1 = inlined_call_operand.hbm [shape: bf16[16,16], index: 1, kind: input, shape index: {}]   ;;  %s1146_s2 = inlined_call_operand.hbm [shape: bf16[16,128], index: 2, kind: input, shape index: {}]   ;;  %s1147_s3 = inlined_call_operand.hbm [shape: bf16[640,128], index: 3, kind: input, shape index: {}]   ;;  %s1148_s4 = inlined_call_operand.vmem [shape: f32[1,128], index: 4, kind: input, shape index: {}]   ;;  %s1149_s5 = inlined_call_operand.hbm [shape: f32[16,128], index: 5, kind: output, shape index: {}]  }
   0x1   :  { %11 = vsyncpa [#allocation7], 0 }
   0x2   :  { %12 = vsyncpa [#allocation10], 0 }
   0x3   :  { %13 = vsyncpa [#allocation5], 0  ;;  %s31_s20 = sshll.u32 %s1145_s1, 4  ;;  %s1083_s21 = smov [#allocation6]   ;;  %s32_s20 = int_to_ptr.hbm [resolvable:$true] %s31_s20 }
   0x4   :  { %s33_s22 = sshll.u32 %s1083_s21, 4  ;;  %s18_s25 = sshll.u32 %s1144_s0, 4  ;;  %s34_s22 = int_to_ptr.vmem [resolvable:$true] %s33_s22  ;;  %s19_s25 = int_to_ptr.hbm [resolvable:$true] %s18_s25 }
   0x5   :  { %s1084_s26 = smov 64   ;;  %s1085_s27 = smov 4  }
   0x6   :  { %39 = dma.hbm_to_vmem [thread:$0]  %s32_s20, 128, %s34_s22, [#allocation7], %s1084_s26, %s1084_s26, %s1085_s27  }
   0x7   :  { %s1086_s28 = smov [#allocation3]   ;;  %s44_s7 = sshll.u32 %s1146_s2, 4  ;;  %s45_s7 = int_to_ptr.hbm [resolvable:$true] %s44_s7 }
   0x8   :  { %s20_s29 = sshll.u32 %s1086_s28, 4  ;;  %s57_s9 = sshll.u32 %s1147_s3, 4  ;;  %s21_s29 = int_to_ptr.vmem [resolvable:$true] %s20_s29  ;;  %s58_s9 = int_to_ptr.hbm [resolvable:$true] %s57_s9 }
   0x9   :  { %26 = dma.hbm_to_vmem [thread:$0]  %s19_s25, 128, %s21_s29, [#allocation4], %s1084_s26, %s1084_s26, %s1085_s27  }
   0xa   :  { %s1087_s10 = smov [#allocation8]   ;;  %s1088_s0 = smov [#allocation9]  }
   0xb   :  { %s46_s11 = sshll.u32 %s1087_s10, 4  ;;  %s59_s12 = sshll.u32 %s1088_s0, 4  ;;  %s47_s11 = int_to_ptr.vmem [resolvable:$true] %s46_s11  ;;  %s60_s12 = int_to_ptr.vmem [resolvable:$true] %s59_s12 }
   0xc   :  { %52 = dma.hbm_to_vmem [thread:$0]  %s45_s7, 128, %s47_s11, [#allocation7], %s1084_s26, %s1084_s26, %s1085_s27  }
   0xd   :  { %65 = dma.hbm_to_vmem [thread:$0]  %s58_s9, 5120, %s60_s12, [#allocation10], %s1084_s26, %s1084_s26, %s1085_s27  }
   0xe   :  { %1075 = dma.done.wait [#allocation4], 128  }
   0xf   :  { %1076 = vsyncadd [#allocation4], 4294967168 }
  0x10   :  { %1077 = dma.done.wait [#allocation7], 256  }
  0x11   :  { %1078 = vsyncadd [#allocation7], 4294967040 }
  0x12   :  { %1079 = dma.done.wait [#allocation10], 5120  }
  0x13   :  { %1080 = vsyncadd [#allocation10], 4294962176  ;;  %v895_v0 = vld [vmem:[#allocation8] sm:$0xff]  ;;  %v896_v1 = vld [vmem:[#allocation3] sm:$0xff]  ;;  %vm102_vm0 = vcmask 130048   ;;  %s1089_s13 = smov [#allocation11]  }
  0x14   :  { %113 = vmatpush.bf16.msra.mxu1 %v895_v0  ;;  %v912_v2 = vld [vmem:[#allocation9 + $0x38] sm:$0xff]  ;;  %v911_v3 = vld [vmem:[#allocation9 + $0x30] sm:$0xff]  ;;  %v910_v4 = vld [vmem:[#allocation9 + $0x28] sm:$0xff]  ;;  %s674_s14 = sshll.u32 %s1089_s13, 4  ;;  %s676_s17 = sshll.u32 %s1149_s5, 4  ;;  %s675_s14 = int_to_ptr.vmem [resolvable:$true] %s674_s14  ;;  %s677_s17 = int_to_ptr.hbm [resolvable:$true] %s676_s17 }
  0x15   :  { %578 = vmatpush.bf16.msra.mxu0 %v912_v2  ;;  %v909_v5 = vld [vmem:[#allocation9 + $0x20] sm:$0xff]  ;;  %v908_v6 = vld [vmem:[#allocation9 + $0x18] sm:$0xff]  ;;  %v907_v8 = vld [vmem:[#allocation9 + $0x10] sm:$0xff]  ;;  %s1091_s18 = smov 8  }
  0x16   :  { %v906_v10 = vld [vmem:[#allocation9 + $0x8] sm:$0xff]  ;;  %v85_v11 = vld [vmem:[#allocation8] sm:$0xf]  ;;  %v86_v12 = vld [vmem:[#allocation8 + $0x4] sm:$0xf] }
  0x17   :  { %699 = vmatmul.msk.bf16.vlgmr.msra.gmra.mxu1 %vm102_vm0, %v896_v1  ;;  %87 = vst [vmem:[#allocation2] sm:$0xf] %v85_v11  ;;  %v905_v14 = vld [vmem:[#allocation9] sm:$0xff]  ;;  %v920_v18 = vld [vmem:[#allocation9 + $0x78] sm:$0xff]  ;;  %v897_v22 = vld [vmem:[#allocation3] sm:$0xff] }
  0x18   :  { %88 = vst [vmem:[#allocation2 + $0x14] sm:$0xf] %v86_v12  ;;  %v919_v24 = vld [vmem:[#allocation9 + $0x70] sm:$0xff]  ;;  %v918_v25 = vld [vmem:[#allocation9 + $0x68] sm:$0xff]  ;;  %v917_v26 = vld [vmem:[#allocation9 + $0x60] sm:$0xff] }
  0x19   :  { %579 = vmatpush.bf16.msra.mxu0 %v911_v3  ;;  %v916_v27 = vld [vmem:[#allocation9 + $0x58] sm:$0xff]  ;;  %v915_v28 = vld [vmem:[#allocation9 + $0x50] sm:$0xff]  ;;  %v914_v29 = vld [vmem:[#allocation9 + $0x48] sm:$0xff] }
  0x1a   :  { %v913_v30 = vld [vmem:[#allocation9 + $0x40] sm:$0xff]  ;;  %v928_v40 = vld [vmem:[#allocation9 + $0xb8] sm:$0xff]  ;;  %v898_v42 = vld [vmem:[#allocation6] sm:$0xff] }
  0x1b   :  { %v927_v43 = vld [vmem:[#allocation9 + $0xb0] sm:$0xff]  ;;  %v926_v44 = vld [vmem:[#allocation9 + $0xa8] sm:$0xff]  ;;  %v925_v45 = vld [vmem:[#allocation9 + $0xa0] sm:$0xff] }
  0x1c   :  { %v924_v46 = vld [vmem:[#allocation9 + $0x98] sm:$0xff]  ;;  %v923_v47 = vld [vmem:[#allocation9 + $0x90] sm:$0xff]  ;;  %v922_v48 = vld [vmem:[#allocation9 + $0x88] sm:$0xff] }
  0x1d   :  { %580 = vmatpush.bf16.msra.mxu0 %v910_v4  ;;  %v921_v49 = vld [vmem:[#allocation9 + $0x80] sm:$0xff]  ;;  %v936_v59 = vld [vmem:[#allocation9 + $0xf8] sm:$0xff]  ;;  %v899_v61 = vld [vmem:[#allocation6] sm:$0xff] }
  0x1e   :  { %v717_v19 = vld [vmem:[#allocation2] sm:$0xf]  ;;  %v944_v62 = vld [vmem:[#allocation9 + $0x138] sm:$0xff]  ;;  %v935_v63 = vld [vmem:[#allocation9 + $0xf0] sm:$0xff] }
  0x1f   :  { %v902_v21 = vld [vmem:[#allocation2 + $0x10] sm:$0xf0]  ;;  %v934_v1 = vld [vmem:[#allocation9 + $0xe8] sm:$0xff]  ;;  %v933_v3 = vld [vmem:[#allocation9 + $0xe0] sm:$0xff] }
  0x20   :  { %v718_v23 = vor.u32 %v902_v21, %v717_v19  ;;  %v943_v0 = vld [vmem:[#allocation9 + $0x130] sm:$0xff]  ;;  %v942_v2 = vld [vmem:[#allocation9 + $0x128] sm:$0xff]  ;;  %v932_v4 = vld [vmem:[#allocation9 + $0xd8] sm:$0xff] }
  0x21   :  { %581 = vmatpush.bf16.msra.mxu0 %v909_v5  ;;  %v931_v5 = vld [vmem:[#allocation9 + $0xd0] sm:$0xff]  ;;  %v941_v11 = vld [vmem:[#allocation9 + $0x120] sm:$0xff]  ;;  %v940_v12 = vld [vmem:[#allocation9 + $0x118] sm:$0xff] }
  0x25   :  { %582 = vmatpush.bf16.msra.mxu0 %v908_v6  ;;  %v930_v6 = vld [vmem:[#allocation9 + $0xc8] sm:$0xff] }
  0x29   :  { %583 = vmatpush.bf16.msra.mxu0 %v907_v8 }
  0x2d   :  { %584 = vmatpush.bf16.msra.mxu0 %v906_v10 }
  0x31   :  { %585 = vmatpush.bf16.msra.mxu0 %v905_v14  ;;  %v938_v14 = vld [vmem:[#allocation9 + $0x108] sm:$0xff] }
  0x34   :  { %586 = vmatmul.bf16.vlgmr.msra.gmra.mxu0 %v718_v23 }
  0x35   :  { %634 = vmatpush.bf16.msrb.mxu0 %v944_v62 }
  0x39   :  { %635 = vmatpush.bf16.msrb.mxu0 %v943_v0 }
  0x3d   :  { %636 = vmatpush.bf16.msrb.mxu0 %v942_v2 }
  0x41   :  { %637 = vmatpush.bf16.msrb.mxu0 %v941_v11 }
  0x45   :  { %638 = vmatpush.bf16.msrb.mxu0 %v940_v12 }
  0x94   :  { %v115_v7 = vpop.f32.mrf.mxu1 }
  0x95   :  { %v120_v9 = vpack.c.bf16 %v115_v7, %v115_v7  ;;  %v929_v7 = vld [vmem:[#allocation9 + $0xc0] sm:$0xff] }
  0x97   :  { %122 = vst [vmem:[#allocation2 + $0x4] sm:$0xf] %v120_v9  ;;  %v133_v16 = vunpack.c.l.b16 %v120_v9 }
  0x9c   :  { %v117_v13 = vpop.f32.mrf.mxu1 }
  0x9d   :  { %v121_v15 = vpack.c.bf16 %v117_v13, %v117_v13  ;;  %v939_v13 = vld [vmem:[#allocation9 + $0x110] sm:$0xff] }
  0x9e   :  { %v900_v32 = vld [vmem:[#allocation2 + $0x4] sm:$0xf]  ;;  %639 = vmatpush.bf16.msrb.mxu0 %v939_v13 }
  0x9f   :  { %123 = vst [vmem:[#allocation2 + $0x18] sm:$0xf] %v121_v15  ;;  %v134_v17 = vunpack.c.l.b16 %v121_v15  ;;  %v937_v15 = vld [vmem:[#allocation9 + $0x100] sm:$0xff] }
  0xa1   :  { %v135_v20 = vpack.c.b16 %v134_v17, %v133_v16 }
  0xa2   :  { %640 = vmatpush.bf16.msrb.mxu0 %v938_v14 }
  0xa3   :  { %147 = vmatpush.bf16.msrb.mxu1 %v135_v20 }
  0xa6   :  { %704 = vmatmul.msk.bf16.vlgmr.msrb.gmra.mxu1 %vm102_vm0, %v897_v22  ;;  %v719_v31 = vld [vmem:[#allocation2 + $0x14] sm:$0xf0]  ;;  %641 = vmatpush.bf16.msrb.mxu0 %v937_v15 }
  0xa7   :  { %592 = vmatpush.bf16.msra.mxu1 %v920_v18  ;;  %v722_v33 = vor.u32 %v900_v32, %v719_v31  ;;  %v954_v31 = vld [vmem:[%s1148_s4] ss:$0 sm:$0xff]  ;;  %s1090_s4 = smov 128  }
  0xab   :  { %593 = vmatpush.bf16.msra.mxu1 %v919_v24 }
  0xaf   :  { %594 = vmatpush.bf16.msra.mxu1 %v918_v25 }
  0xb1   :  { %v587_v23 = vpop.f32.mrf.mxu0 }
  0xb3   :  { %595 = vmatpush.bf16.msra.mxu1 %v917_v26 }
  0xb7   :  { %596 = vmatpush.bf16.msra.mxu1 %v916_v27 }
  0xb9   :  { %v589_v25 = vpop.f32.mrf.mxu0 }
  0xbb   :  { %597 = vmatpush.bf16.msra.mxu1 %v915_v28 }
  0xbf   :  { %598 = vmatpush.bf16.msra.mxu1 %v914_v29 }
  0xc3   :  { %599 = vmatpush.bf16.msra.mxu1 %v913_v30 }
  0xc6   :  { %600 = vmatmul.bf16.vlgmr.msra.gmra.mxu1 %v722_v33 }
 0x123   :  { %v149_v34 = vpop.f32.mrf.mxu1 }
 0x124   :  { %v154_v35 = vpack.c.bf16 %v149_v34, %v149_v34 }
 0x126   :  { %156 = vst [vmem:[#allocation2 + $0x8] sm:$0xf] %v154_v35  ;;  %v167_v38 = vunpack.c.l.b16 %v154_v35 }
 0x12b   :  { %v151_v36 = vpop.f32.mrf.mxu1 }
 0x12c   :  { %v155_v37 = vpack.c.bf16 %v151_v36, %v151_v36 }
 0x12d   :  { %v725_v51 = vld [vmem:[#allocation2 + $0x8] sm:$0xf] }
 0x12e   :  { %157 = vst [vmem:[#allocation2 + $0x1c] sm:$0xf] %v155_v37  ;;  %v168_v39 = vunpack.c.l.b16 %v155_v37 }
 0x130   :  { %v169_v41 = vpack.c.b16 %v168_v39, %v167_v38 }
 0x132   :  { %181 = vmatpush.bf16.msra.mxu2 %v169_v41 }
 0x135   :  { %709 = vmatmul.msk.bf16.vlgmr.msra.gmra.mxu2 %vm102_vm0, %v898_v42  ;;  %v903_v50 = vld [vmem:[#allocation2 + $0x18] sm:$0xf0] }
 0x136   :  { %606 = vmatpush.bf16.msrb.mxu2 %v928_v40  ;;  %v726_v52 = vor.u32 %v903_v50, %v725_v51 }
 0x13a   :  { %607 = vmatpush.bf16.msrb.mxu2 %v927_v43 }
 0x13e   :  { %608 = vmatpush.bf16.msrb.mxu2 %v926_v44 }
 0x142   :  { %609 = vmatpush.bf16.msrb.mxu2 %v925_v45 }
 0x143   :  { %v601_v24 = vpop.f32.mrf.mxu1 }
 0x144   :  { %v602_v28 = vadd.f32 %v601_v24, %v587_v23 }
 0x146   :  { %610 = vmatpush.bf16.msrb.mxu2 %v924_v46 }
 0x14a   :  { %611 = vmatpush.bf16.msrb.mxu2 %v923_v47 }
 0x14b   :  { %v603_v32 = vpop.f32.mrf.mxu1 }
 0x14c   :  { %v604_v36 = vadd.f32 %v603_v32, %v589_v25 }
 0x14e   :  { %612 = vmatpush.bf16.msrb.mxu2 %v922_v48 }
 0x152   :  { %613 = vmatpush.bf16.msrb.mxu2 %v921_v49 }
 0x155   :  { %614 = vmatmul.bf16.vlgmr.msrb.gmra.mxu2 %v726_v52 }
 0x1b8   :  { %v183_v53 = vpop.f32.mrf.mxu2 }
 0x1b9   :  { %v188_v54 = vpack.c.bf16 %v183_v53, %v183_v53 }
 0x1bb   :  { %190 = vst [vmem:[#allocation2 + $0xc] sm:$0xf] %v188_v54  ;;  %v201_v57 = vunpack.c.l.b16 %v188_v54 }
 0x1c0   :  { %v185_v55 = vpop.f32.mrf.mxu2 }
 0x1c1   :  { %v189_v56 = vpack.c.bf16 %v185_v55, %v185_v55 }
 0x1c2   :  { %v901_v9 = vld [vmem:[#allocation2 + $0xc] sm:$0xf] }
 0x1c3   :  { %191 = vst [vmem:[#allocation2 + $0x20] sm:$0xf] %v189_v56  ;;  %v202_v58 = vunpack.c.l.b16 %v189_v56 }
 0x1c5   :  { %v203_v60 = vpack.c.b16 %v202_v58, %v201_v57 }
 0x1c7   :  { %215 = vmatpush.bf16.msra.mxu3 %v203_v60 }
 0x1ca   :  { %714 = vmatmul.msk.bf16.vlgmr.msra.gmra.mxu3 %vm102_vm0, %v899_v61  ;;  %v727_v8 = vld [vmem:[#allocation2 + $0x1c] sm:$0xf0] }
 0x1cb   :  { %620 = vmatpush.bf16.msrb.mxu3 %v936_v59  ;;  %v730_v10 = vor.u32 %v901_v9, %v727_v8 }
 0x1cf   :  { %621 = vmatpush.bf16.msrb.mxu3 %v935_v63 }
 0x1d3   :  { %622 = vmatpush.bf16.msrb.mxu3 %v934_v1 }
 0x1d7   :  { %623 = vmatpush.bf16.msrb.mxu3 %v933_v3 }
 0x1d8   :  { %v615_v26 = vpop.f32.mrf.mxu2 }
 0x1d9   :  { %v616_v29 = vadd.f32 %v615_v26, %v602_v28 }
 0x1db   :  { %624 = vmatpush.bf16.msrb.mxu3 %v932_v4 }
 0x1df   :  { %625 = vmatpush.bf16.msrb.mxu3 %v931_v5 }
 0x1e0   :  { %v617_v35 = vpop.f32.mrf.mxu2 }
 0x1e1   :  { %v618_v39 = vadd.f32 %v617_v35, %v604_v36 }
 0x1e3   :  { %626 = vmatpush.bf16.msrb.mxu3 %v930_v6 }
 0x1e7   :  { %627 = vmatpush.bf16.msrb.mxu3 %v929_v7 }
 0x1ea   :  { %628 = vmatmul.bf16.vlgmr.msrb.gmra.mxu3 %v730_v10 }
 0x24d   :  { %v217_v16 = vpop.f32.mrf.mxu3 }
 0x24e   :  { %v222_v17 = vpack.c.bf16 %v217_v16, %v217_v16 }
 0x250   :  { %224 = vst [vmem:[#allocation2 + $0x10] sm:$0xf] %v222_v17 }
 0x255   :  { %v219_v18 = vpop.f32.mrf.mxu3 }
 0x256   :  { %v223_v19 = vpack.c.bf16 %v219_v18, %v219_v18 }
 0x257   :  { %v733_v20 = vld [vmem:[#allocation2 + $0x10] sm:$0xf] }
 0x258   :  { %225 = vst [vmem:[#allocation2 + $0x24] sm:$0xf] %v223_v19 }
 0x25f   :  { %v904_v21 = vld [vmem:[#allocation2 + $0x20] sm:$0xf0] }
 0x260   :  { %v734_v22 = vor.u32 %v904_v21, %v733_v20 }
 0x262   :  { %642 = vmatmul.bf16.vlgmr.msrb.gmra.mxu0 %v734_v22 }
 0x26d   :  { %v629_v27 = vpop.f32.mrf.mxu3 }
 0x26e   :  { %v630_v30 = vadd.f32 %v629_v27, %v616_v29 }
 0x275   :  { %v631_v38 = vpop.f32.mrf.mxu3 }
 0x276   :  { %v632_v40 = vadd.f32 %v631_v38, %v618_v39 }
 0x2df   :  { %v643_v33 = vpop.f32.mrf.mxu0 }
 0x2e0   :  { %v644_v34 = vadd.f32 %v643_v33, %v630_v30 }
 0x2e2   :  { %v656_v37 = vadd.f32 %v954_v31, %v644_v34 }
 0x2e4   :  { %658 = vst [vmem:[#allocation11] sm:$0xff] %v656_v37 }
 0x2e7   :  { %v645_v41 = vpop.f32.mrf.mxu0 }
 0x2e8   :  { %v646_v42 = vadd.f32 %v645_v41, %v632_v40 }
 0x2ea   :  { %v657_v43 = vadd.f32 %v954_v31, %v646_v42 }
 0x2ec   :  { %659 = vst [vmem:[#allocation11 + $0x8] sm:$0xff] %v657_v43 }
 0x2ed   :  { %682 = dma.vmem_to_hbm [thread:$0]  %s675_s14, 256, %s677_s17, [#allocation5], %s1090_s4, %s1090_s4, %s1091_s18  }
 0x2ee   :  { %1081 = dma.done.wait [#allocation5], 256  }
 0x2ef   :  { %1082 = vsyncadd [#allocation5], 4294967040 }
 0x2f0   :  { %687 = vsyncpa [#allocation4], 1 }
 0x2f1   :  { %688 = vsyncpa [#allocation7], 1 }
 0x2f2   :  { %689 = vsyncpa [#allocation10], 1 }
 0x2f3   :  { %690 = vsyncpa [#allocation5], 1 }

</bundles_post_ra>
